<compile_context>
chip_gen: v5e
topology: v5e:2x2
jax: 0.10.0
libtpu: 0.0.40
codegen_flags: <defaults>
</compile_context>

<pallas_src>
import numpy as np
import jax
import jax.numpy as jnp
from jax import lax
from jax.experimental import pallas as pl
from jax.experimental.pallas import tpu as pltpu

F32 = jnp.float32
EPS = 1e-5

# ---- config (MetaFormerABC(in_channels=4, dims=(32,64), depths=(1,2), norm='ln')) ----
IN_CH = 4
DIMS = (32, 64)
DEPTHS = (1, 2)
PATCH = 4       # patch-embedding conv kernel/stride
DS = 2          # downsampling conv kernel/stride
MLP_RATIO = 4
STAR_SCALE = 0.8944271909999159   # StarReLU default scale
STAR_BIAS = -0.4472135954999579   # StarReLU default bias

# Token-tile cap: big enough for MXU/HBM efficiency, small enough (with
# double-buffering and the 4x-wide MLP hidden) to stay under v7x's 64 MiB VMEM.
MAX_TOKEN_ROWS = 256

_PAR1 = pltpu.CompilerParams(dimension_semantics=("parallel",))


def _round_up(n, m):
    return ((n + m - 1) // m) * m


def _pad_rows(x, mult):
    """Pad the leading (token) axis up to a multiple of `mult` (masked/sliced later)."""
    t = x.shape[0]
    tp = _round_up(t, mult)
    if tp != t:
        x = jnp.pad(x, ((0, tp - t), (0, 0)))
    return x, t


def _layer_norm(x, g, b):
    """ConvLayerNorm: LayerNorm over the channel (last) dim, per token."""
    mu = jnp.mean(x, axis=-1, keepdims=True)
    var = jnp.mean((x - mu) ** 2, axis=-1, keepdims=True)
    return (x - mu) * lax.rsqrt(var + EPS) * g + b


# ----------------------------- Pallas kernels --------------------------------

def _patch_embed_kernel(x_ref, w_ref, b_ref, pe_ref, o_ref):
    # pooling[0]: Conv(k=s=PATCH) as matmul, fused with bias + sincos pos-emb add.
    o_ref[0] = (jnp.dot(x_ref[0], w_ref[...], preferred_element_type=F32)
                + b_ref[...] + pe_ref[...])


def _patch_embed(x_bpk, w, b, pe_tok):
    B, HW, K = x_bpk.shape
    D = w.shape[1]
    return pl.pallas_call(
        _patch_embed_kernel,
        out_shape=jax.ShapeDtypeStruct((B, HW, D), F32),
        grid=(B,),
        in_specs=[pl.BlockSpec((1, HW, K), lambda i: (i, 0, 0)),
                  pl.BlockSpec((K, D), lambda i: (0, 0)),
                  pl.BlockSpec((1, D), lambda i: (0, 0)),
                  # PE shared across batch: single (hw, D) block, NOT tiled B times.
                  pl.BlockSpec((HW, D), lambda i: (0, 0))],
        out_specs=pl.BlockSpec((1, HW, D), lambda i: (i, 0, 0)),
        compiler_params=_PAR1,
    )(x_bpk, w, b, pe_tok)


def _linear_kernel(x_ref, w_ref, b_ref, o_ref):
    # pooling[i>=1]: stride-DS conv downsample as a token matmul (+ bias). No PE.
    o_ref[...] = jnp.dot(x_ref[...], w_ref[...], preferred_element_type=F32) + b_ref[...]


def _linear(x, w, b):
    T0, K = x.shape
    D = w.shape[1]
    tt = min(MAX_TOKEN_ROWS, _round_up(T0, 8))
    x, _ = _pad_rows(x, tt)
    Tp = x.shape[0]
    out = pl.pallas_call(
        _linear_kernel,
        out_shape=jax.ShapeDtypeStruct((Tp, D), F32),
        grid=(Tp // tt,),
        in_specs=[pl.BlockSpec((tt, K), lambda i: (i, 0)),
                  pl.BlockSpec((K, D), lambda i: (0, 0)),
                  pl.BlockSpec((1, D), lambda i: (0, 0))],
        out_specs=pl.BlockSpec((tt, D), lambda i: (i, 0)),
        compiler_params=_PAR1,
    )(x, w, b)
    return out if Tp == T0 else out[:T0]


def _block_kernel(x_ref, m_ref, g1_ref, bt1_ref, g2_ref, bt2_ref,
                  w1_ref, b1_ref, w2_ref, b2_ref, star_ref, o_ref):
    # One full MetaFormer block, fully fused, one image per grid step.
    xv = x_ref[0]                                               # (hw, d)
    # token mixer: x + (AvgPool3x3 - Id)(ConvLN(x)); pooling expressed as a
    # precomputed (hw, hw) mixing matrix m = P - I.
    y = _layer_norm(xv, g1_ref[...], bt1_ref[...])
    xm = xv + jnp.dot(m_ref[...], y, preferred_element_type=F32)
    # channel MLP: x + fc2(StarReLU(fc1(ConvLN(x))))
    u = _layer_norm(xm, g2_ref[...], bt2_ref[...])
    h = jnp.dot(u, w1_ref[...], preferred_element_type=F32) + b1_ref[...]
    h = jnp.maximum(h, 0.0)
    h = star_ref[0] * h * h + star_ref[1]                       # StarReLU (SMEM scalars)
    o_ref[0] = xm + jnp.dot(h, w2_ref[...], preferred_element_type=F32) + b2_ref[...]


def _metaformer_block(x_bpd, mix_m, blk):
    B, HW, D = x_bpd.shape
    Hd = blk['w1'].shape[1]

    def rep(shape):
        return pl.BlockSpec(shape, lambda i: (0, 0))

    return pl.pallas_call(
        _block_kernel,
        out_shape=jax.ShapeDtypeStruct((B, HW, D), F32),
        grid=(B,),
        in_specs=[pl.BlockSpec((1, HW, D), lambda i: (i, 0, 0)),
                  rep((HW, HW)),
                  rep((1, D)), rep((1, D)), rep((1, D)), rep((1, D)),
                  rep((D, Hd)), rep((1, Hd)), rep((Hd, D)), rep((1, D)),
                  pl.BlockSpec(memory_space=pltpu.MemorySpace.SMEM)],
        out_specs=pl.BlockSpec((1, HW, D), lambda i: (i, 0, 0)),
        compiler_params=_PAR1,
    )(x_bpd, mix_m, blk['ln1_g'], blk['ln1_b'], blk['ln2_g'], blk['ln2_b'],
      blk['w1'], blk['b1'], blk['w2'], blk['b2'], blk['star'])


def _head_kernel(x_ref, g_ref, b_ref, o_ref):
    # pool(x) = global average over tokens, then norm_out = LayerNorm(out_dim)
    xv = x_ref[...]                                   # (1, T, D)
    m = jnp.mean(xv, axis=1, keepdims=True)           # (1, 1, D)
    mu = jnp.mean(m, axis=-1, keepdims=True)
    var = jnp.mean((m - mu) ** 2, axis=-1, keepdims=True)
    o_ref[...] = (m - mu) * lax.rsqrt(var + EPS) * g_ref[...] + b_ref[...]


def _head(x_btd, g, b):
    B, T, D = x_btd.shape
    # TODO(synk): for very large token counts, tile the token axis with a VMEM accumulator.
    out = pl.pallas_call(
        _head_kernel,
        out_shape=jax.ShapeDtypeStruct((B, 1, D), F32),
        grid=(B,),
        in_specs=[pl.BlockSpec((1, T, D), lambda i: (i, 0, 0)),
                  pl.BlockSpec((1, D), lambda i: (0, 0)),
                  pl.BlockSpec((1, D), lambda i: (0, 0))],
        out_specs=pl.BlockSpec((1, 1, D), lambda i: (i, 0, 0)),
        compiler_params=_PAR1,
    )(x_btd, g, b)
    return out.reshape(B, D)


# ------------------------------ JAX glue --------------------------------------

def posemb_sincos_2d(dim, h, w, temperature=10000.0):
    """Replicates the torch function, including the `.view(1, dim, h, w)` quirk."""
    assert dim % 4 == 0, 'feature dimension must be multiple of 4 for sincos emb'
    y, x = jnp.meshgrid(jnp.arange(h), jnp.arange(w), indexing='ij')
    omega = jnp.arange(dim // 4) / (dim // 4 - 1)
    omega = 1.0 / temperature ** omega
    y = y.reshape(-1)[:, None] * omega[None, :]
    x = x.reshape(-1)[:, None] * omega[None, :]
    pe = jnp.concatenate((jnp.sin(x), jnp.cos(x), jnp.sin(y), jnp.cos(y)), axis=1)
    return pe.astype(F32).reshape(1, dim, h, w)       # raw reshape == torch .view


def _pool_mix_matrix(h, w):
    """(AvgPool2d(3, stride=1, pad=1, count_include_pad=False) - Identity) as a
    dense (h*w, h*w) token-mixing matrix, applied per image inside the fused
    block kernel so the whole mixer stays in one Pallas kernel."""
    # TODO(synk): for large spatial maps, replace with a halo-tiled pooling kernel
    # instead of the dense hw x hw mixing matrix.
    m = np.zeros((h * w, h * w), dtype=np.float32)
    for i in range(h):
        for j in range(w):
            nbrs = [(i + di, j + dj) for di in (-1, 0, 1) for dj in (-1, 0, 1)
                    if 0 <= i + di < h and 0 <= j + dj < w]
            for (ii, jj) in nbrs:
                m[i * w + j, ii * w + jj] += 1.0 / len(nbrs)
    m -= np.eye(h * w, dtype=np.float32)
    return jnp.asarray(m)


def init_params(key):
    keys = list(jax.random.split(key, 16))
    kit = iter(keys)

    def nrm(shape, scale=0.02):
        return (scale * jax.random.normal(next(kit), shape)).astype(F32)

    p = {
        'embed_w': nrm((IN_CH * PATCH * PATCH, DIMS[0])),
        'embed_b': jnp.zeros((1, DIMS[0]), F32),
        'out_g': jnp.ones((1, DIMS[-1]), F32),
        'out_b': jnp.zeros((1, DIMS[-1]), F32),
        'stages': [],
    }
    for i in range(1, len(DIMS)):
        dp, d = DIMS[i - 1], DIMS[i]
        st = {'ds_w': nrm((dp * DS * DS, d)),
              'ds_b': jnp.zeros((1, d), F32),
              'blocks': []}
        for _ in range(DEPTHS[i]):
            st['blocks'].append({
                'ln1_g': jnp.ones((1, d), F32), 'ln1_b': jnp.zeros((1, d), F32),
                'ln2_g': jnp.ones((1, d), F32), 'ln2_b': jnp.zeros((1, d), F32),
                'w1': nrm((d, MLP_RATIO * d)),
                'b1': jnp.zeros((1, MLP_RATIO * d), F32),
                'w2': nrm((MLP_RATIO * d, d)),
                'b2': jnp.zeros((1, d), F32),
                'star': jnp.array([STAR_SCALE, STAR_BIAS], dtype=F32),
            })
        p['stages'].append(st)
    return p


def metaformer_forward(x_nchw, params):
    B, C, H, W = x_nchw.shape

    # pooling[0]: patch-embedding conv (k == s == PATCH) as a per-image token matmul.
    h, w = H // PATCH, W // PATCH
    hw = h * w
    xt = x_nchw.reshape(B, C, h, PATCH, w, PATCH)
    xt = xt.transpose(0, 2, 4, 1, 3, 5).reshape(B, hw, C * PATCH * PATCH).astype(F32)

    # patchmasking_prob == 0.0 -> nn.Identity()
    # TODO(synk): PatchMasking2D (training-time random patch masking) not implemented for prob > 0.

    # x = x + posemb_sincos_2d(x)   (use_pos_emb=True), PE shared across batch,
    # fused into the patch-embed kernel.
    pe_tok = (posemb_sincos_2d(DIMS[0], h, w)
              .transpose(0, 2, 3, 1).reshape(hw, DIMS[0]).astype(F32))
    x = _patch_embed(xt, params['embed_w'], params['embed_b'], pe_tok)   # (B, hw, dims[0])

    # stages i >= 1 (blocks[0] is never applied by the reference forward loop)
    for i in range(1, len(DIMS)):
        st = params['stages'][i - 1]
        d_prev, d = DIMS[i - 1], DIMS[i]

        # pooling[i]: stride-2 conv downsample as a token matmul (no PE, no zero reads).
        xm = x.reshape(B, h, w, d_prev)
        h, w = h // DS, w // DS
        hw = h * w
        xm = xm.reshape(B, h, DS, w, DS, d_prev).transpose(0, 1, 3, 2, 4, 5)
        xm = xm.reshape(B * hw, DS * DS * d_prev)
        x = _linear(xm, st['ds_w'], st['ds_b']).reshape(B, hw, d)

        # blocks[i]: each block is ONE fused Pallas kernel
        # (LN1 + 3x3 avg-pool mixer + residual + LN2 + MLP/StarReLU + residual).
        mix_m = _pool_mix_matrix(h, w)
        for blk in st['blocks']:
            x = _metaformer_block(x, mix_m, blk)

    # pool() is abstract -> global average pool over tokens; norm_out = LayerNorm(dims[-1])
    return _head(x, params['out_g'], params['out_b'])


if __name__ == "__main__":
    x = jax.random.normal(jax.random.PRNGKey(0), (2, IN_CH, 16, 16), dtype=F32)  # NCHW
    params = init_params(jax.random.PRNGKey(42))
    fwd = jax.jit(metaformer_forward)
    out = jax.block_until_ready(fwd(x, params))
    assert out.shape == (2, DIMS[-1]) and out.dtype == F32
    assert bool(jnp.all(jnp.isfinite(out)))
    print("KERNEL_OK")
</pallas_src>

<mosaic_0001>
module attributes {stable_mosaic.version = 11 : i64} {
  func.func @_patch_embed_kernel(%arg0: i32, %arg1: memref<1x16x64xf32, #tpu.memory_space<vmem>>, %arg2: memref<64x32xf32, #tpu.memory_space<vmem>>, %arg3: memref<1x32xf32, #tpu.memory_space<vmem>>, %arg4: memref<16x32xf32, #tpu.memory_space<vmem>>, %arg5: memref<1x16x32xf32, #tpu.memory_space<vmem>>) attributes {dimension_semantics = [#tpu.dimension_semantics<parallel>], iteration_bounds = array<i64: 2>, scalar_prefetch = 0 : i64, scratch_operands = 0 : i64, tpu.core_type = #tpu.core_type<tc>, window_params = [{transform_indices = @transform_0, window_bounds = array<i64: 1, 16, 64>}, {pipeline_mode = #tpu.pipeline_mode<synchronous>, transform_indices = @transform_1, window_bounds = array<i64: 64, 32>}, {pipeline_mode = #tpu.pipeline_mode<synchronous>, transform_indices = @transform_2, window_bounds = array<i64: 1, 32>}, {pipeline_mode = #tpu.pipeline_mode<synchronous>, transform_indices = @transform_3, window_bounds = array<i64: 16, 32>}, {transform_indices = @transform_4, window_bounds = array<i64: 1, 16, 32>}]} {
    %c0 = arith.constant 0 : index
    %c0_0 = arith.constant 0 : index
    %c0_1 = arith.constant 0 : index
    %0 = vector.load %arg1[%c0, %c0_0, %c0_1] : memref<1x16x64xf32, #tpu.memory_space<vmem>>, vector<1x16x64xf32>
    %1 = vector.shape_cast %0 : vector<1x16x64xf32> to vector<16x64xf32>
    %c0_2 = arith.constant 0 : index
    %c0_3 = arith.constant 0 : index
    %2 = vector.load %arg2[%c0_2, %c0_3] : memref<64x32xf32, #tpu.memory_space<vmem>>, vector<64x32xf32>
    %cst = arith.constant dense<0.000000e+00> : vector<16x32xf32>
    %3 = tpu.matmul %1, %2, %cst {dimension_numbers = #tpu.dot_dimension_numbers<[1], [0], [0], [1], [0, 0, 1, 1], [], []>} : vector<16x64xf32>, vector<64x32xf32>, vector<16x32xf32> -> vector<16x32xf32>
    %c0_4 = arith.constant 0 : index
    %c0_5 = arith.constant 0 : index
    %4 = vector.load %arg3[%c0_4, %c0_5] : memref<1x32xf32, #tpu.memory_space<vmem>>, vector<1x32xf32>
    %5 = vector.broadcast %4 : vector<1x32xf32> to vector<16x32xf32>
    %6 = arith.addf %3, %5 : vector<16x32xf32>
    %c0_6 = arith.constant 0 : index
    %c0_7 = arith.constant 0 : index
    %7 = vector.load %arg4[%c0_6, %c0_7] : memref<16x32xf32, #tpu.memory_space<vmem>>, vector<16x32xf32>
    %8 = arith.addf %6, %7 : vector<16x32xf32>
    %c0_8 = arith.constant 0 : index
    %c0_9 = arith.constant 0 : index
    %c0_10 = arith.constant 0 : index
    %9 = vector.load %arg5[%c0_8, %c0_9, %c0_10] : memref<1x16x32xf32, #tpu.memory_space<vmem>>, vector<1x16x32xf32>
    %10 = vector.shape_cast %9 : vector<1x16x32xf32> to vector<16x32xf32>
    %11 = vector.shape_cast %8 : vector<16x32xf32> to vector<1x16x32xf32>
    tpu.vector_store %arg5[%c0_8, %c0_9, %c0_10], %11 {strides = array<i32>} : memref<1x16x32xf32, #tpu.memory_space<vmem>>, vector<1x16x32xf32>,
    return
  }
  func.func @transform_0(%arg0: i32) -> (i32, i32, i32) {
    %c0_i32 = arith.constant 0 : i32
    %c0_i32_0 = arith.constant 0 : i32
    %c0_i32_1 = arith.constant 0 : i32
    return %arg0, %c0_i32, %c0_i32_0 : i32, i32, i32
  }
  func.func @transform_1(%arg0: i32) -> (i32, i32) {
    %c0_i32 = arith.constant 0 : i32
    %c0_i32_0 = arith.constant 0 : i32
    %c0_i32_1 = arith.constant 0 : i32
    return %c0_i32, %c0_i32_0 : i32, i32
  }
  func.func @transform_2(%arg0: i32) -> (i32, i32) {
    %c0_i32 = arith.constant 0 : i32
    %c0_i32_0 = arith.constant 0 : i32
    %c0_i32_1 = arith.constant 0 : i32
    return %c0_i32, %c0_i32_0 : i32, i32
  }
  func.func @transform_3(%arg0: i32) -> (i32, i32) {
    %c0_i32 = arith.constant 0 : i32
    %c0_i32_0 = arith.constant 0 : i32
    %c0_i32_1 = arith.constant 0 : i32
    return %c0_i32, %c0_i32_0 : i32, i32
  }
  func.func @transform_4(%arg0: i32) -> (i32, i32, i32) {
    %c0_i32 = arith.constant 0 : i32
    %c0_i32_0 = arith.constant 0 : i32
    %c0_i32_1 = arith.constant 0 : i32
    return %arg0, %c0_i32, %c0_i32_0 : i32, i32, i32
  }
}

module attributes {stable_mosaic.version = 11 : i64} {
  func.func @_linear_kernel(%arg0: i32, %arg1: memref<8x128xf32, #tpu.memory_space<vmem>>, %arg2: memref<128x64xf32, #tpu.memory_space<vmem>>, %arg3: memref<1x64xf32, #tpu.memory_space<vmem>>, %arg4: memref<8x64xf32, #tpu.memory_space<vmem>>) attributes {dimension_semantics = [#tpu.dimension_semantics<parallel>], iteration_bounds = array<i64: 1>, scalar_prefetch = 0 : i64, scratch_operands = 0 : i64, tpu.core_type = #tpu.core_type<tc>, window_params = [{transform_indices = @transform_0, window_bounds = array<i64: 8, 128>}, {pipeline_mode = #tpu.pipeline_mode<synchronous>, transform_indices = @transform_1, window_bounds = array<i64: 128, 64>}, {pipeline_mode = #tpu.pipeline_mode<synchronous>, transform_indices = @transform_2, window_bounds = array<i64: 1, 64>}, {transform_indices = @transform_3, window_bounds = array<i64: 8, 64>}]} {
    %c0 = arith.constant 0 : index
    %c0_0 = arith.constant 0 : index
    %0 = vector.load %arg1[%c0, %c0_0] : memref<8x128xf32, #tpu.memory_space<vmem>>, vector<8x128xf32>
    %c0_1 = arith.constant 0 : index
    %c0_2 = arith.constant 0 : index
    %1 = vector.load %arg2[%c0_1, %c0_2] : memref<128x64xf32, #tpu.memory_space<vmem>>, vector<128x64xf32>
    %cst = arith.constant dense<0.000000e+00> : vector<8x64xf32>
    %2 = tpu.matmul %0, %1, %cst {dimension_numbers = #tpu.dot_dimension_numbers<[1], [0], [0], [1], [0, 0, 1, 1], [], []>} : vector<8x128xf32>, vector<128x64xf32>, vector<8x64xf32> -> vector<8x64xf32>
    %c0_3 = arith.constant 0 : index
    %c0_4 = arith.constant 0 : index
    %3 = vector.load %arg3[%c0_3, %c0_4] : memref<1x64xf32, #tpu.memory_space<vmem>>, vector<1x64xf32>
    %4 = vector.broadcast %3 : vector<1x64xf32> to vector<8x64xf32>
    %5 = arith.addf %2, %4 : vector<8x64xf32>
    %c0_5 = arith.constant 0 : index
    %c0_6 = arith.constant 0 : index
    %6 = vector.load %arg4[%c0_5, %c0_6] : memref<8x64xf32, #tpu.memory_space<vmem>>, vector<8x64xf32>
    tpu.vector_store %arg4[%c0_5, %c0_6], %5 {strides = array<i32>} : memref<8x64xf32, #tpu.memory_space<vmem>>, vector<8x64xf32>,
    return
  }
  func.func @transform_0(%arg0: i32) -> (i32, i32) {
    %c0_i32 = arith.constant 0 : i32
    %c0_i32_0 = arith.constant 0 : i32
    return %arg0, %c0_i32 : i32, i32
  }
  func.func @transform_1(%arg0: i32) -> (i32, i32) {
    %c0_i32 = arith.constant 0 : i32
    %c0_i32_0 = arith.constant 0 : i32
    %c0_i32_1 = arith.constant 0 : i32
    return %c0_i32, %c0_i32_0 : i32, i32
  }
  func.func @transform_2(%arg0: i32) -> (i32, i32) {
    %c0_i32 = arith.constant 0 : i32
    %c0_i32_0 = arith.constant 0 : i32
    %c0_i32_1 = arith.constant 0 : i32
    return %c0_i32, %c0_i32_0 : i32, i32
  }
  func.func @transform_3(%arg0: i32) -> (i32, i32) {
    %c0_i32 = arith.constant 0 : i32
    %c0_i32_0 = arith.constant 0 : i32
    return %arg0, %c0_i32 : i32, i32
  }
}

module attributes {stable_mosaic.version = 11 : i64} {
  func.func @_block_kernel(%arg0: i32, %arg1: memref<1x4x64xf32, #tpu.memory_space<vmem>>, %arg2: memref<4x4xf32, #tpu.memory_space<vmem>>, %arg3: memref<1x64xf32, #tpu.memory_space<vmem>>, %arg4: memref<1x64xf32, #tpu.memory_space<vmem>>, %arg5: memref<1x64xf32, #tpu.memory_space<vmem>>, %arg6: memref<1x64xf32, #tpu.memory_space<vmem>>, %arg7: memref<64x256xf32, #tpu.memory_space<vmem>>, %arg8: memref<1x256xf32, #tpu.memory_space<vmem>>, %arg9: memref<256x64xf32, #tpu.memory_space<vmem>>, %arg10: memref<1x64xf32, #tpu.memory_space<vmem>>, %arg11: memref<2xf32, #tpu.memory_space<smem>>, %arg12: memref<1x4x64xf32, #tpu.memory_space<vmem>>) attributes {dimension_semantics = [#tpu.dimension_semantics<parallel>], iteration_bounds = array<i64: 2>, scalar_prefetch = 0 : i64, scratch_operands = 0 : i64, tpu.core_type = #tpu.core_type<tc>, window_params = [{transform_indices = @transform_0, window_bounds = array<i64: 1, 4, 64>}, {pipeline_mode = #tpu.pipeline_mode<synchronous>, transform_indices = @transform_1, window_bounds = array<i64: 4, 4>}, {pipeline_mode = #tpu.pipeline_mode<synchronous>, transform_indices = @transform_2, window_bounds = array<i64: 1, 64>}, {pipeline_mode = #tpu.pipeline_mode<synchronous>, transform_indices = @transform_3, window_bounds = array<i64: 1, 64>}, {pipeline_mode = #tpu.pipeline_mode<synchronous>, transform_indices = @transform_4, window_bounds = array<i64: 1, 64>}, {pipeline_mode = #tpu.pipeline_mode<synchronous>, transform_indices = @transform_5, window_bounds = array<i64: 1, 64>}, {pipeline_mode = #tpu.pipeline_mode<synchronous>, transform_indices = @transform_6, window_bounds = array<i64: 64, 256>}, {pipeline_mode = #tpu.pipeline_mode<synchronous>, transform_indices = @transform_7, window_bounds = array<i64: 1, 256>}, {pipeline_mode = #tpu.pipeline_mode<synchronous>, transform_indices = @transform_8, window_bounds = array<i64: 256, 64>}, {pipeline_mode = #tpu.pipeline_mode<synchronous>, transform_indices = @transform_9, window_bounds = array<i64: 1, 64>}, {transform_indices = @transform_10, window_bounds = array<i64: 2>}, {transform_indices = @transform_11, window_bounds = array<i64: 1, 4, 64>}]} {
    %c0 = arith.constant 0 : index
    %c0_0 = arith.constant 0 : index
    %c0_1 = arith.constant 0 : index
    %0 = vector.load %arg1[%c0, %c0_0, %c0_1] : memref<1x4x64xf32, #tpu.memory_space<vmem>>, vector<1x4x64xf32>
    %1 = vector.shape_cast %0 : vector<1x4x64xf32> to vector<4x64xf32>
    %c0_2 = arith.constant 0 : index
    %c0_3 = arith.constant 0 : index
    %2 = vector.load %arg3[%c0_2, %c0_3] : memref<1x64xf32, #tpu.memory_space<vmem>>, vector<1x64xf32>
    %c0_4 = arith.constant 0 : index
    %c0_5 = arith.constant 0 : index
    %3 = vector.load %arg4[%c0_4, %c0_5] : memref<1x64xf32, #tpu.memory_space<vmem>>, vector<1x64xf32>
    %cst = arith.constant dense<0.000000e+00> : vector<4xf32>
    %4 = vector.multi_reduction <add>, %1, %cst [1] : vector<4x64xf32> to vector<4xf32>
    %5 = vector.shape_cast %4 : vector<4xf32> to vector<4x1xf32>
    %cst_6 = arith.constant 6.400000e+01 : f32
    %6 = vector.broadcast %cst_6 : f32 to vector<4x1xf32>
    %7 = arith.divf %5, %6 : vector<4x1xf32>
    %8 = vector.broadcast %7 : vector<4x1xf32> to vector<4x64xf32>
    %9 = arith.subf %1, %8 : vector<4x64xf32>
    %10 = arith.mulf %9, %9 : vector<4x64xf32>
    %cst_7 = arith.constant dense<0.000000e+00> : vector<4xf32>
    %11 = vector.multi_reduction <add>, %10, %cst_7 [1] : vector<4x64xf32> to vector<4xf32>
    %12 = vector.shape_cast %11 : vector<4xf32> to vector<4x1xf32>
    %cst_8 = arith.constant 6.400000e+01 : f32
    %13 = vector.broadcast %cst_8 : f32 to vector<4x1xf32>
    %14 = arith.divf %12, %13 : vector<4x1xf32>
    %15 = vector.broadcast %7 : vector<4x1xf32> to vector<4x64xf32>
    %16 = arith.subf %1, %15 : vector<4x64xf32>
    %cst_9 = arith.constant 9.99999974E-6 : f32
    %17 = vector.broadcast %cst_9 : f32 to vector<4x1xf32>
    %18 = arith.addf %14, %17 : vector<4x1xf32>
    %19 = math.rsqrt %18 : vector<4x1xf32>
    %20 = vector.broadcast %19 : vector<4x1xf32> to vector<4x64xf32>
    %21 = arith.mulf %16, %20 : vector<4x64xf32>
    %22 = vector.broadcast %2 : vector<1x64xf32> to vector<4x64xf32>
    %23 = arith.mulf %21, %22 : vector<4x64xf32>
    %24 = vector.broadcast %3 : vector<1x64xf32> to vector<4x64xf32>
    %25 = arith.addf %23, %24 : vector<4x64xf32>
    %c0_10 = arith.constant 0 : index
    %c0_11 = arith.constant 0 : index
    %26 = vector.load %arg2[%c0_10, %c0_11] : memref<4x4xf32, #tpu.memory_space<vmem>>, vector<4x4xf32>
    %cst_12 = arith.constant dense<0.000000e+00> : vector<4x64xf32>
    %27 = tpu.matmul %26, %25, %cst_12 {dimension_numbers = #tpu.dot_dimension_numbers<[1], [0], [0], [1], [0, 0, 1, 1], [], []>} : vector<4x4xf32>, vector<4x64xf32>, vector<4x64xf32> -> vector<4x64xf32>
    %28 = arith.addf %1, %27 : vector<4x64xf32>
    %c0_13 = arith.constant 0 : index
    %c0_14 = arith.constant 0 : index
    %29 = vector.load %arg5[%c0_13, %c0_14] : memref<1x64xf32, #tpu.memory_space<vmem>>, vector<1x64xf32>
    %c0_15 = arith.constant 0 : index
    %c0_16 = arith.constant 0 : index
    %30 = vector.load %arg6[%c0_15, %c0_16] : memref<1x64xf32, #tpu.memory_space<vmem>>, vector<1x64xf32>
    %cst_17 = arith.constant dense<0.000000e+00> : vector<4xf32>
    %31 = vector.multi_reduction <add>, %28, %cst_17 [1] : vector<4x64xf32> to vector<4xf32>
    %32 = vector.shape_cast %31 : vector<4xf32> to vector<4x1xf32>
    %cst_18 = arith.constant 6.400000e+01 : f32
    %33 = vector.broadcast %cst_18 : f32 to vector<4x1xf32>
    %34 = arith.divf %32, %33 : vector<4x1xf32>
    %35 = vector.broadcast %34 : vector<4x1xf32> to vector<4x64xf32>
    %36 = arith.subf %28, %35 : vector<4x64xf32>
    %37 = arith.mulf %36, %36 : vector<4x64xf32>
    %cst_19 = arith.constant dense<0.000000e+00> : vector<4xf32>
    %38 = vector.multi_reduction <add>, %37, %cst_19 [1] : vector<4x64xf32> to vector<4xf32>
    %39 = vector.shape_cast %38 : vector<4xf32> to vector<4x1xf32>
    %cst_20 = arith.constant 6.400000e+01 : f32
    %40 = vector.broadcast %cst_20 : f32 to vector<4x1xf32>
    %41 = arith.divf %39, %40 : vector<4x1xf32>
    %42 = vector.broadcast %34 : vector<4x1xf32> to vector<4x64xf32>
    %43 = arith.subf %28, %42 : vector<4x64xf32>
    %cst_21 = arith.constant 9.99999974E-6 : f32
    %44 = vector.broadcast %cst_21 : f32 to vector<4x1xf32>
    %45 = arith.addf %41, %44 : vector<4x1xf32>
    %46 = math.rsqrt %45 : vector<4x1xf32>
    %47 = vector.broadcast %46 : vector<4x1xf32> to vector<4x64xf32>
    %48 = arith.mulf %43, %47 : vector<4x64xf32>
    %49 = vector.broadcast %29 : vector<1x64xf32> to vector<4x64xf32>
    %50 = arith.mulf %48, %49 : vector<4x64xf32>
    %51 = vector.broadcast %30 : vector<1x64xf32> to vector<4x64xf32>
    %52 = arith.addf %50, %51 : vector<4x64xf32>
    %c0_22 = arith.constant 0 : index
    %c0_23 = arith.constant 0 : index
    %53 = vector.load %arg7[%c0_22, %c0_23] : memref<64x256xf32, #tpu.memory_space<vmem>>, vector<64x256xf32>
    %cst_24 = arith.constant dense<0.000000e+00> : vector<4x256xf32>
    %54 = tpu.matmul %52, %53, %cst_24 {dimension_numbers = #tpu.dot_dimension_numbers<[1], [0], [0], [1], [0, 0, 1, 1], [], []>} : vector<4x64xf32>, vector<64x256xf32>, vector<4x256xf32> -> vector<4x256xf32>
    %c0_25 = arith.constant 0 : index
    %c0_26 = arith.constant 0 : index
    %55 = vector.load %arg8[%c0_25, %c0_26] : memref<1x256xf32, #tpu.memory_space<vmem>>, vector<1x256xf32>
    %56 = vector.broadcast %55 : vector<1x256xf32> to vector<4x256xf32>
    %57 = arith.addf %54, %56 : vector<4x256xf32>
    %cst_27 = arith.constant 0.000000e+00 : f32
    %58 = vector.broadcast %cst_27 : f32 to vector<4x256xf32>
    %59 = arith.maximumf %57, %58 : vector<4x256xf32>
    %c0_28 = arith.constant 0 : index
    %60 = memref.load %arg11[%c0_28] : memref<2xf32, #tpu.memory_space<smem>>
    %61 = vector.broadcast %60 : f32 to vector<4x256xf32>
    %62 = arith.mulf %61, %59 : vector<4x256xf32>
    %63 = arith.mulf %62, %59 : vector<4x256xf32>
    %c1 = arith.constant 1 : index
    %64 = memref.load %arg11[%c1] : memref<2xf32, #tpu.memory_space<smem>>
    %65 = vector.broadcast %64 : f32 to vector<4x256xf32>
    %66 = arith.addf %63, %65 : vector<4x256xf32>
    %c0_29 = arith.constant 0 : index
    %c0_30 = arith.constant 0 : index
    %67 = vector.load %arg9[%c0_29, %c0_30] : memref<256x64xf32, #tpu.memory_space<vmem>>, vector<256x64xf32>
    %cst_31 = arith.constant dense<0.000000e+00> : vector<4x64xf32>
    %68 = tpu.matmul %66, %67, %cst_31 {dimension_numbers = #tpu.dot_dimension_numbers<[1], [0], [0], [1], [0, 0, 1, 1], [], []>} : vector<4x256xf32>, vector<256x64xf32>, vector<4x64xf32> -> vector<4x64xf32>
    %69 = arith.addf %28, %68 : vector<4x64xf32>
    %c0_32 = arith.constant 0 : index
    %c0_33 = arith.constant 0 : index
    %70 = vector.load %arg10[%c0_32, %c0_33] : memref<1x64xf32, #tpu.memory_space<vmem>>, vector<1x64xf32>
    %71 = vector.broadcast %70 : vector<1x64xf32> to vector<4x64xf32>
    %72 = arith.addf %69, %71 : vector<4x64xf32>
    %c0_34 = arith.constant 0 : index
    %c0_35 = arith.constant 0 : index
    %c0_36 = arith.constant 0 : index
    %73 = vector.load %arg12[%c0_34, %c0_35, %c0_36] : memref<1x4x64xf32, #tpu.memory_space<vmem>>, vector<1x4x64xf32>
    %74 = vector.shape_cast %73 : vector<1x4x64xf32> to vector<4x64xf32>
    %75 = vector.shape_cast %72 : vector<4x64xf32> to vector<1x4x64xf32>
    tpu.vector_store %arg12[%c0_34, %c0_35, %c0_36], %75 {strides = array<i32>} : memref<1x4x64xf32, #tpu.memory_space<vmem>>, vector<1x4x64xf32>,
    return
  }
  func.func @transform_0(%arg0: i32) -> (i32, i32, i32) {
    %c0_i32 = arith.constant 0 : i32
    %c0_i32_0 = arith.constant 0 : i32
    %c0_i32_1 = arith.constant 0 : i32
    return %arg0, %c0_i32, %c0_i32_0 : i32, i32, i32
  }
  func.func @transform_1(%arg0: i32) -> (i32, i32) {
    %c0_i32 = arith.constant 0 : i32
    %c0_i32_0 = arith.constant 0 : i32
    %c0_i32_1 = arith.constant 0 : i32
    return %c0_i32, %c0_i32_0 : i32, i32
  }
  func.func @transform_2(%arg0: i32) -> (i32, i32) {
    %c0_i32 = arith.constant 0 : i32
    %c0_i32_0 = arith.constant 0 : i32
    %c0_i32_1 = arith.constant 0 : i32
    return %c0_i32, %c0_i32_0 : i32, i32
  }
  func.func @transform_3(%arg0: i32) -> (i32, i32) {
    %c0_i32 = arith.constant 0 : i32
    %c0_i32_0 = arith.constant 0 : i32
    %c0_i32_1 = arith.constant 0 : i32
    return %c0_i32, %c0_i32_0 : i32, i32
  }
  func.func @transform_4(%arg0: i32) -> (i32, i32) {
    %c0_i32 = arith.constant 0 : i32
    %c0_i32_0 = arith.constant 0 : i32
    %c0_i32_1 = arith.constant 0 : i32
    return %c0_i32, %c0_i32_0 : i32, i32
  }
  func.func @transform_5(%arg0: i32) -> (i32, i32) {
    %c0_i32 = arith.constant 0 : i32
    %c0_i32_0 = arith.constant 0 : i32
    %c0_i32_1 = arith.constant 0 : i32
    return %c0_i32, %c0_i32_0 : i32, i32
  }
  func.func @transform_6(%arg0: i32) -> (i32, i32) {
    %c0_i32 = arith.constant 0 : i32
    %c0_i32_0 = arith.constant 0 : i32
    %c0_i32_1 = arith.constant 0 : i32
    return %c0_i32, %c0_i32_0 : i32, i32
  }
  func.func @transform_7(%arg0: i32) -> (i32, i32) {
    %c0_i32 = arith.constant 0 : i32
    %c0_i32_0 = arith.constant 0 : i32
    %c0_i32_1 = arith.constant 0 : i32
    return %c0_i32, %c0_i32_0 : i32, i32
  }
  func.func @transform_8(%arg0: i32) -> (i32, i32) {
    %c0_i32 = arith.constant 0 : i32
    %c0_i32_0 = arith.constant 0 : i32
    %c0_i32_1 = arith.constant 0 : i32
    return %c0_i32, %c0_i32_0 : i32, i32
  }
  func.func @transform_9(%arg0: i32) -> (i32, i32) {
    %c0_i32 = arith.constant 0 : i32
    %c0_i32_0 = arith.constant 0 : i32
    %c0_i32_1 = arith.constant 0 : i32
    return %c0_i32, %c0_i32_0 : i32, i32
  }
  func.func @transform_10(%arg0: i32) -> i32 {
    %c0_i32 = arith.constant 0 : i32
    %c0_i32_0 = arith.constant 0 : i32
    return %c0_i32 : i32
  }
  func.func @transform_11(%arg0: i32) -> (i32, i32, i32) {
    %c0_i32 = arith.constant 0 : i32
    %c0_i32_0 = arith.constant 0 : i32
    %c0_i32_1 = arith.constant 0 : i32
    return %arg0, %c0_i32, %c0_i32_0 : i32, i32, i32
  }
}

module attributes {stable_mosaic.version = 11 : i64} {
  func.func @_head_kernel(%arg0: i32, %arg1: memref<1x4x64xf32, #tpu.memory_space<vmem>>, %arg2: memref<1x64xf32, #tpu.memory_space<vmem>>, %arg3: memref<1x64xf32, #tpu.memory_space<vmem>>, %arg4: memref<1x1x64xf32, #tpu.memory_space<vmem>>) attributes {dimension_semantics = [#tpu.dimension_semantics<parallel>], iteration_bounds = array<i64: 2>, scalar_prefetch = 0 : i64, scratch_operands = 0 : i64, tpu.core_type = #tpu.core_type<tc>, window_params = [{transform_indices = @transform_0, window_bounds = array<i64: 1, 4, 64>}, {pipeline_mode = #tpu.pipeline_mode<synchronous>, transform_indices = @transform_1, window_bounds = array<i64: 1, 64>}, {pipeline_mode = #tpu.pipeline_mode<synchronous>, transform_indices = @transform_2, window_bounds = array<i64: 1, 64>}, {transform_indices = @transform_3, window_bounds = array<i64: 1, 1, 64>}]} {
    %c0 = arith.constant 0 : index
    %c0_0 = arith.constant 0 : index
    %c0_1 = arith.constant 0 : index
    %0 = vector.load %arg1[%c0, %c0_0, %c0_1] : memref<1x4x64xf32, #tpu.memory_space<vmem>>, vector<1x4x64xf32>
    %cst = arith.constant dense<0.000000e+00> : vector<1x64xf32>
    %1 = vector.multi_reduction <add>, %0, %cst [1] : vector<1x4x64xf32> to vector<1x64xf32>
    %2 = vector.shape_cast %1 : vector<1x64xf32> to vector<1x1x64xf32>
    %cst_2 = arith.constant 4.000000e+00 : f32
    %3 = vector.broadcast %cst_2 : f32 to vector<1x1x64xf32>
    %4 = arith.divf %2, %3 : vector<1x1x64xf32>
    %cst_3 = arith.constant dense<0.000000e+00> : vector<1x1xf32>
    %5 = vector.multi_reduction <add>, %4, %cst_3 [2] : vector<1x1x64xf32> to vector<1x1xf32>
    %6 = vector.shape_cast %5 : vector<1x1xf32> to vector<1x1x1xf32>
    %cst_4 = arith.constant 6.400000e+01 : f32
    %7 = vector.broadcast %cst_4 : f32 to vector<1x1x1xf32>
    %8 = arith.divf %6, %7 : vector<1x1x1xf32>
    %9 = vector.broadcast %8 : vector<1x1x1xf32> to vector<1x1x64xf32>
    %10 = arith.subf %4, %9 : vector<1x1x64xf32>
    %11 = arith.mulf %10, %10 : vector<1x1x64xf32>
    %cst_5 = arith.constant dense<0.000000e+00> : vector<1x1xf32>
    %12 = vector.multi_reduction <add>, %11, %cst_5 [2] : vector<1x1x64xf32> to vector<1x1xf32>
    %13 = vector.shape_cast %12 : vector<1x1xf32> to vector<1x1x1xf32>
    %cst_6 = arith.constant 6.400000e+01 : f32
    %14 = vector.broadcast %cst_6 : f32 to vector<1x1x1xf32>
    %15 = arith.divf %13, %14 : vector<1x1x1xf32>
    %16 = vector.broadcast %8 : vector<1x1x1xf32> to vector<1x1x64xf32>
    %17 = arith.subf %4, %16 : vector<1x1x64xf32>
    %cst_7 = arith.constant 9.99999974E-6 : f32
    %18 = vector.broadcast %cst_7 : f32 to vector<1x1x1xf32>
    %19 = arith.addf %15, %18 : vector<1x1x1xf32>
    %20 = math.rsqrt %19 : vector<1x1x1xf32>
    %21 = vector.broadcast %20 : vector<1x1x1xf32> to vector<1x1x64xf32>
    %22 = arith.mulf %17, %21 : vector<1x1x64xf32>
    %c0_8 = arith.constant 0 : index
    %c0_9 = arith.constant 0 : index
    %23 = vector.load %arg2[%c0_8, %c0_9] : memref<1x64xf32, #tpu.memory_space<vmem>>, vector<1x64xf32>
    %24 = vector.shape_cast %23 : vector<1x64xf32> to vector<1x1x64xf32>
    %25 = arith.mulf %22, %24 : vector<1x1x64xf32>
    %c0_10 = arith.constant 0 : index
    %c0_11 = arith.constant 0 : index
    %26 = vector.load %arg3[%c0_10, %c0_11] : memref<1x64xf32, #tpu.memory_space<vmem>>, vector<1x64xf32>
    %27 = vector.shape_cast %26 : vector<1x64xf32> to vector<1x1x64xf32>
    %28 = arith.addf %25, %27 : vector<1x1x64xf32>
    %c0_12 = arith.constant 0 : index
    %c0_13 = arith.constant 0 : index
    %c0_14 = arith.constant 0 : index
    %29 = vector.load %arg4[%c0_12, %c0_13, %c0_14] : memref<1x1x64xf32, #tpu.memory_space<vmem>>, vector<1x1x64xf32>
    tpu.vector_store %arg4[%c0_12, %c0_13, %c0_14], %28 {strides = array<i32>} : memref<1x1x64xf32, #tpu.memory_space<vmem>>, vector<1x1x64xf32>,
    return
  }
  func.func @transform_0(%arg0: i32) -> (i32, i32, i32) {
    %c0_i32 = arith.constant 0 : i32
    %c0_i32_0 = arith.constant 0 : i32
    %c0_i32_1 = arith.constant 0 : i32
    return %arg0, %c0_i32, %c0_i32_0 : i32, i32, i32
  }
  func.func @transform_1(%arg0: i32) -> (i32, i32) {
    %c0_i32 = arith.constant 0 : i32
    %c0_i32_0 = arith.constant 0 : i32
    %c0_i32_1 = arith.constant 0 : i32
    return %c0_i32, %c0_i32_0 : i32, i32
  }
  func.func @transform_2(%arg0: i32) -> (i32, i32) {
    %c0_i32 = arith.constant 0 : i32
    %c0_i32_0 = arith.constant 0 : i32
    %c0_i32_1 = arith.constant 0 : i32
    return %c0_i32, %c0_i32_0 : i32, i32
  }
  func.func @transform_3(%arg0: i32) -> (i32, i32, i32) {
    %c0_i32 = arith.constant 0 : i32
    %c0_i32_0 = arith.constant 0 : i32
    %c0_i32_1 = arith.constant 0 : i32
    return %arg0, %c0_i32, %c0_i32_0 : i32, i32, i32
  }
}

</mosaic_0001>

<bundles_post_ra>
// kernel: metaformer_forward.6
= control target key start
LH: loop header
LB: loop body
LE: loop exit
PB: predicated region body
PF: predicated region fallthrough
CT: control target
= control target key end

     0   :  { %vm55_vm0 = vcmask 523264   ;;  %s139_s1 = inlined_call_operand.vmem [shape: f32[128,64], index: 1, kind: input, shape index: {}]   ;;  %s140_s2 = inlined_call_operand.vmem [shape: f32[1,64], index: 2, kind: input, shape index: {}]   ;;  %s141_s0 = inlined_call_operand.vmem [shape: f32[8,128], index: 0, kind: input, shape index: {}]   ;;  %s142_s3 = inlined_call_operand.vmem [shape: f32[8,64], index: 3, kind: output, shape index: {}]  }
   0x1   :  { %v30_v0 = vld [vmem:[%s139_s1 + $0x78] sm:$0xff]  ;;  %v29_v1 = vld [vmem:[%s139_s1 + $0x70] sm:$0xff]  ;;  %v28_v2 = vld [vmem:[%s139_s1 + $0x68] sm:$0xff] }
   0x2   :  { %35 = vmatpush.msra.mxu0 %v30_v0  ;;  %v27_v3 = vld [vmem:[%s139_s1 + $0x60] sm:$0xff]  ;;  %v26_v4 = vld [vmem:[%s139_s1 + $0x58] sm:$0xff]  ;;  %v25_v5 = vld [vmem:[%s139_s1 + $0x50] sm:$0xff] }
   0x3   :  { %v24_v6 = vld [vmem:[%s139_s1 + $0x48] sm:$0xff]  ;;  %v23_v7 = vld [vmem:[%s139_s1 + $0x40] sm:$0xff]  ;;  %v22_v8 = vld [vmem:[%s139_s1 + $0x38] sm:$0xff] }
   0x4   :  { %36 = vmatpush.msra.mxu0 %v29_v1  ;;  %v21_v9 = vld [vmem:[%s139_s1 + $0x30] sm:$0xff]  ;;  %v20_v10 = vld [vmem:[%s139_s1 + $0x28] sm:$0xff]  ;;  %v19_v11 = vld [vmem:[%s139_s1 + $0x20] sm:$0xff] }
   0x5   :  { %v18_v12 = vld [vmem:[%s139_s1 + $0x18] sm:$0xff]  ;;  %v17_v13 = vld [vmem:[%s139_s1 + $0x10] sm:$0xff]  ;;  %v16_v14 = vld [vmem:[%s139_s1 + $0x8] sm:$0xff] }
   0x6   :  { %37 = vmatpush.msra.mxu0 %v28_v2  ;;  %v15_v15 = vld [vmem:[%s139_s1] sm:$0xff] }
   0x7   :  { %v14_v16 = vld [vmem:[%s141_s0] sm:$0xff] }
   0x8   :  { %38 = vmatpush.msra.mxu0 %v27_v3  ;;  %v61_v17 = vld [vmem:[%s140_s2] ss:$0 sm:$0xff] }
   0xa   :  { %39 = vmatpush.msra.mxu0 %v26_v4 }
   0xc   :  { %40 = vmatpush.msra.mxu0 %v25_v5 }
   0xe   :  { %41 = vmatpush.msra.mxu0 %v24_v6 }
  0x10   :  { %42 = vmatpush.msra.mxu0 %v23_v7 }
  0x12   :  { %43 = vmatpush.msra.mxu0 %v22_v8 }
  0x14   :  { %44 = vmatpush.msra.mxu0 %v21_v9 }
  0x16   :  { %45 = vmatpush.msra.mxu0 %v20_v10 }
  0x18   :  { %46 = vmatpush.msra.mxu0 %v19_v11 }
  0x1a   :  { %47 = vmatpush.msra.mxu0 %v18_v12 }
  0x1c   :  { %48 = vmatpush.msra.mxu0 %v17_v13 }
  0x1e   :  { %49 = vmatpush.msra.mxu0 %v16_v14 }
  0x20   :  { %50 = vmatpush.msra.mxu0 %v15_v15 }
  0x21   :  { %51 = vmatmul.f32.vlgmr.msra.gmra.mxu0 %v14_v16 }
  0x9e   :  { %v52_v18 = vpop.f32.mrf.mxu0 }
  0x9f   :  { %v53_v19 = vadd.f32 %v61_v17, %v52_v18 }
  0xa1   :  { %56 = vst.msk [vmem:[%s142_s3] sm:$0xff] %vm55_vm0, %v53_v19 }

// kernel: metaformer_forward.5
= control target key start
LH: loop header
LB: loop body
LE: loop exit
PB: predicated region body
PF: predicated region fallthrough
CT: control target
= control target key end

     0   :  { %s369_s15 = smov 0   ;;  %s422_s0 = inlined_call_operand.vmem [shape: f32[2,16,64], index: 0, kind: input, shape index: {}]   ;;  %s423_s1 = inlined_call_operand.vmem [shape: f32[64,32], index: 1, kind: input, shape index: {}]   ;;  %s424_s2 = inlined_call_operand.vmem [shape: f32[1,32], index: 2, kind: input, shape index: {}]   ;;  %s425_s3 = inlined_call_operand.vmem [shape: f32[16,32], index: 3, kind: input, shape index: {}]   ;;  %s426_s4 = inlined_call_operand.vmem [shape: f32[2,16,32], index: 4, kind: output, shape index: {}]  }
   0x1 LB: > { %s304_s16 = sadd.s32 4294967295, %s342_s15   ;;  %p308_p0 = scmp.ge.s32.totalorder %s342_s15, 1  ;;  %s342_s15 = sphi %s369_s15, %s14_s15  }
   0x2   : > { %p162_p1 = scmp.lt.s32.totalorder %s342_s15, 3 }
   0x4   : > { %p163_p2 = pnand %p308_p0, %p162_p1 }
   0x5   : > { %p188_p3 = scmp.lt.s32.totalorder (!%p163_p2), %s304_s16, 1 }
   0x6   : > { %166 = sbr.rel (%p163_p2) target bundleno = 159 (0x9f), region = 36 }
   0xb   : > { %v207_v0 = vld [vmem:[%s423_s1 + $0x38] sm:$0xff]  ;;  %v206_v1 = vld [vmem:[%s423_s1 + $0x30] sm:$0xff]  ;;  %v205_v2 = vld [vmem:[%s423_s1 + $0x28] sm:$0xff]  ;;  %s428_s16 = smov (!%p188_p3, %s304_s16), 1  ;;  %vm212_vm0 = vcmask 523264   ;;  %vm246_vm1 = vcmask 261120  }
   0xc   : > { %227 = vmatpush.msra.mxu0 %v207_v0  ;;  %319 = vmatpush.msra.mxu1 %v207_v0  ;;  %v204_v3 = vld [vmem:[%s423_s1 + $0x20] sm:$0xff]  ;;  %v203_v4 = vld [vmem:[%s423_s1 + $0x18] sm:$0xff]  ;;  %s317_s27 = sshll.u32 %s428_s16, 4  ;;  %v202_v5 = vld [vmem:[%s423_s1 + $0x10] sm:$0xff] }
   0xd   : > { %v201_v6 = vld [vmem:[%s423_s1 + $0x8] sm:$0xff]  ;;  %s192_s8 = scalar_lea.vmem %s422_s0, %s317_s27  ;;  %v200_v7 = vld [vmem:[%s423_s1] sm:$0xff]  ;;  %s197_s20 = scalar_lea.vmem %s426_s4, %s317_s27 }
   0xe   : > { %228 = vmatpush.msra.mxu0 %v206_v1  ;;  %320 = vmatpush.msra.mxu1 %v206_v1  ;;  %v198_v8 = vld [vmem:[%s192_s8] sm:$0xff]  ;;  %v199_v9 = vld [vmem:[%s192_s8 + $0x8] sm:$0xff] }
   0xf   : > { %v335_v10 = vld [vmem:[%s424_s2] ss:$0 sm:$0xff]  ;;  %v243_v14 = vld [vmem:[%s425_s3 + $0x8] sm:$0xff] }
  0x10   : > { %229 = vmatpush.msra.mxu0 %v205_v2  ;;  %321 = vmatpush.msra.mxu1 %v205_v2  ;;  %v242_v12 = vld [vmem:[%s425_s3] sm:$0xff] }
  0x12   : > { %230 = vmatpush.msra.mxu0 %v204_v3  ;;  %322 = vmatpush.msra.mxu1 %v204_v3 }
  0x14   : > { %231 = vmatpush.msra.mxu0 %v203_v4  ;;  %323 = vmatpush.msra.mxu1 %v203_v4 }
  0x16   : > { %232 = vmatpush.msra.mxu0 %v202_v5  ;;  %324 = vmatpush.msra.mxu1 %v202_v5 }
  0x18   : > { %233 = vmatpush.msra.mxu0 %v201_v6  ;;  %325 = vmatpush.msra.mxu1 %v201_v6 }
  0x1a   : > { %234 = vmatpush.msra.mxu0 %v200_v7  ;;  %326 = vmatpush.msra.mxu1 %v200_v7 }
  0x1b   : > { %313 = vmatmul.msk.f32.vlgmr.msra.gmra.mxu0 %vm212_vm0, %v198_v8  ;;  %314 = vmatmul.msk.f32.vlgmr.msra.gmra.mxu1 %vm212_vm0, %v199_v9 }
  0x98   : > { %v236_v11 = vpop.f32.mrf.mxu0  ;;  %v239_v13 = vpop.f32.mrf.mxu1 }
  0x99   : > { %v237_v15 = vadd.f32 %v335_v10, %v236_v11  ;;  %v240_v16 = vadd.f32 %v335_v10, %v239_v13 }
  0x9b   : > { %v244_v17 = vadd.f32 %v242_v12, %v237_v15  ;;  %v245_v18 = vadd.f32 %v243_v14, %v240_v16 }
  0x9d   : > { %247 = vst.msk [vmem:[%s197_s20] sm:$0xff] %vm246_vm1, %v244_v17 }
  0x9e   : > { %248 = vst.msk [vmem:[%s197_s20 + $0x8] sm:$0xff] %vm246_vm1, %v245_v18 }
  0x9f PF: > { %s14_s15 = sadd.s32 1, %s342_s15  }
  0xa0   : > { %p11_p4 = scmp.ge.s32.totalorder %s14_s15, 4  }
  0xa2   :  { %13 = sbr.rel (!%p11_p4) target bundleno = 1 (0x1), region = 66 }

// kernel: metaformer_forward.9
= control target key start
LH: loop header
LB: loop body
LE: loop exit
PB: predicated region body
PF: predicated region fallthrough
CT: control target
= control target key end

     0   :  { %8 = vsyncpa [#allocation3], 0  ;;  %s519_s0 = inlined_call_operand.vmem [shape: f32[2,4,64], index: 0, kind: input, shape index: {}]   ;;  %s520_s1 = inlined_call_operand.vmem [shape: f32[1,64], index: 1, kind: input, shape index: {}]   ;;  %s521_s2 = inlined_call_operand.vmem [shape: f32[1,64], index: 2, kind: input, shape index: {}]   ;;  %s522_s3 = inlined_call_operand.hbm [shape: f32[2,1,64], index: 3, kind: output, shape index: {}]  }
   0x1   :  { %10 = vsyncpa [#allocation3 + $0x1], 0  ;;  %s426_s12 = smov 0   ;;  %s428_s13 = smov 0  }
   0x2   :  { %s430_s14 = smov 0   ;;  %s432_s15 = smov 0  }
   0x3 LB: > { %s447_s16 = sadd.s32 4294967295, %s402_s15   ;;  %s286_s17 = sadd.s32 4294967294, %s402_s15   ;;  %s402_s15 = sphi %s432_s15, %s528_s15   ;;  %s398_s14 = sphi %s430_s14, %s527_s14   ;;  %s394_s13 = sphi %s428_s13, %s526_s13   ;;  %s390_s12 = sphi %s426_s12, %s525_s12  }
   0x4   : > { %s451_s18 = sadd.s32 1, %s402_s15   ;;  %s91_s19 = sadd.s32 1, %s398_s14 }
   0x5   : > { %s88_s20 = ssub.s32 %s402_s15, %s451_s18  ;;  %p101_p0 = scmp.ne.s32.totalorder %s398_s14, %s394_s13 }
   0x6   : > { %p89_p1 = scmp.eq.s32.totalorder %s88_s20, 0  ;;  %p102_p2 = scmp.eq.s32.totalorder %s447_s16, 1 }
   0x7   : > { %p107_p3 = scmp.ne.s32.totalorder %s394_s13, %s390_s12  ;;  %p108_p4 = scmp.eq.s32.totalorder %s286_s17, 1 }
   0x8   : > { %s462_s21 = scalar_select %p89_p1, %s398_s14, %s91_s19  }
   0x9   : > { %p464_p5 = por %p102_p2, %p101_p0  ;;  %p468_p6 = por %p108_p4, %p107_p3 }
   0xa   : > { %p289_p7 = scmp.ge.s32.totalorder %s402_s15, 1  ;;  %p139_p8 = scmp.lt.s32.totalorder %s402_s15, 3 }
   0xc   : > { %p140_p9 = pnand %p289_p7, %p139_p8 }
   0xd   : > { %p161_p10 = scmp.lt.s32.totalorder (!%p140_p9), %s447_s16, 1  ;;  %s159_s29 = sand.u32 (!%p140_p9), 1, %s394_s13  }
   0xe   : > { %143 = sbr.rel (%p140_p9) target bundleno = 310 (0x136), region = 32  ;;  %s227_s5 = scalar_lea.hbm (!%p140_p9), %s522_s3, %s447_s16 }
   0xf   : > { %s160_s10 = scalar_lea.vmem (!%p140_p9), [#allocation2], %s159_s29  ;;  %s231_s17 = sshll.u32 (!%p140_p9), %s227_s5, 4  ;;  %s232_s17 = int_to_ptr.hbm [resolvable:$true] %s231_s17 }
  0x10   : > { %s229_s11 = sshll.u32 (!%p140_p9), %s160_s10, 4  ;;  %s354_s19 = sshra.s32 (!%p140_p9), %s232_s17, 4  ;;  %s230_s11 = int_to_ptr.vmem [resolvable:$true] %s229_s11  ;;  %s355_s19 = int_to_ptr.hbm [resolvable:$true] %s354_s19 }
  0x11   : > { %s356_s20 = scalar_lea.hbm (!%p140_p9), %s355_s19, 1  ;;  %s360_s26 = scalar_lea.hbm (!%p140_p9), %s522_s3, 2 }
  0x12   : > { %p357_p11 = scmp.ne.s32.totalorder (!%p140_p9), %s355_s19, %s356_s20  ;;  %p361_p0 = scmp.lt.s32.totalorder (!%p140_p9), %s355_s19, %s522_s3 }
  0x13   : > { %v404_v0 = vmov 4.0   ;;  %s162_s24 = scalar_select %p161_p10, %s447_s16, 1  ;;  %vm166_vm0 = vcmask 519168   ;;  %vm182_vm2 = vcmask 523264   ;;  %v405_v17 = vmov 64.0  }
  0x14   : > { %334 = vrcp.f32 %v404_v0  ;;  %v212_v39 = vld [vmem:[%s520_s1] sm:$0x1]  ;;  %vm216_vm7 = vcmask 516096   ;;  %s219_s16 = scalar_lea.sflag [#allocation3], %s159_s29  ;;  %p358_p12 = pnand %p357_p11, %p464_p5 }
  0x15   : > { %s290_s25 = sshll.u32 %s162_s24, 2  ;;  %336 = vrcp.f32 %v405_v17  ;;  %v214_v41 = vld [vmem:[%s521_s2] sm:$0x1]  ;;  %p362_p1 = scmp.lt.s32.totalorder %s360_s26, %s356_s20 }
  0x16   : > { %s164_s28 = scalar_lea.vmem %s519_s0, %s290_s25  ;;  %p359_p13 = pneg %p358_p12 }
  0x17   : > { %v165_v1 = vld [vmem:[%s164_s28] sm:$0xf]  ;;  %p363_p2 = por %p362_p1, %p361_p0 }
  0x18   : > { %v167_v3 = vsel %vm166_vm0, %v165_v1, 0.0 }
  0x19   : > { %v168_v4 = vrot.slane %v167_v3, 4  ;;  %p364_p3 = pnand %p363_p2, %p359_p13 }
  0x1a   : > { %v335_v2 = vpop.eup %334 }
  0x1b   : > { %v175_v5 = vmul.f32 4.0, %v335_v2  ;;  %v169_v6 = vadd.f32 %v168_v4, %v167_v3  ;;  %vm179_vm1 = vweird.f32 %v335_v2  ;;  %v337_v18 = vpop.eup %336 }
  0x1c   : > { %v187_v19 = vmul.f32 64.0, %v337_v18  ;;  %vm191_vm3 = vweird.f32 %v337_v18 }
  0x1d   : > { %v176_v7 = vsub.f32 1.0, %v175_v5  ;;  %v170_v8 = vrot.slane %v169_v6, 2 }
  0x1e   : > { %v188_v20 = vsub.f32 1.0, %v187_v19 }
  0x1f   : > { %v177_v9 = vmul.f32 %v335_v2, %v176_v7  ;;  %v171_v10 = vadd.f32 %v170_v8, %v169_v6 }
  0x20   : > { %v189_v21 = vmul.f32 %v337_v18, %v188_v20 }
  0x21   : > { %v178_v11 = vadd.f32 %v335_v2, %v177_v9  ;;  %v172_v12 = vrot.slane %v171_v10, 1 }
  0x22   : > { %v190_v22 = vadd.f32 %v337_v18, %v189_v21 }
  0x23   : > { %v180_v13 = vsel %vm179_vm1, %v335_v2, %v178_v11  ;;  %v173_v14 = vadd.f32 %v172_v12, %v171_v10 }
  0x24   : > { %v192_v23 = vsel %vm191_vm3, %v337_v18, %v190_v22 }
  0x25   : > { %v181_v15 = vmul.f32 %v180_v13, %v173_v14 }
  0x27   : > { %v183_v16 = vsel %vm182_vm2, %v181_v15, 0.0 }
  0x28   : > { %184 = vadd.xlane.f32.xlu0 %v183_v16 }
  0x9b   : > { %v185_v24 = vpop.xlane.xlu0 %184 }
  0x9c   : > { %v193_v25 = vmul.f32 %v192_v23, %v185_v24 }
  0x9e   : > { %v194_v26 = vsub.f32 %v181_v15, %v193_v25 }
  0xa0   : > { %v195_v27 = vmul.f32 %v194_v26, %v194_v26 }
  0xa2   : > { %v196_v28 = vsel %vm182_vm2, %v195_v27, 0.0 }
  0xa3   : > { %197 = vadd.xlane.f32.xlu0 %v196_v28 }
 0x116   : > { %v198_v29 = vpop.xlane.xlu0 %197 }
 0x117   : > { %v199_v30 = vmul.f32 %v198_v29, %v192_v23 }
 0x119   : > { %v200_v31 = vadd.f32 1e-05, %v199_v30 }
 0x11b   : > { %338 = vrsqrt.f32 %v200_v31  ;;  %vm207_vm5 = vweird.f32 %v200_v31 }
 0x121   : > { %v339_v32 = vpop.eup %338 }
 0x122   : > { %v202_v33 = vmul.f32 %v339_v32, %v200_v31  ;;  %vm208_vm4 = vweird.f32 %v339_v32 }
 0x123   : > { %vm209_vm6 = vmor %vm207_vm5, %vm208_vm4 }
 0x124   : > { %v203_v34 = vmul.f32 %v339_v32, %v202_v33 }
 0x126   : > { %v204_v35 = vmul.f32 0.5, %v203_v34 }
 0x128   : > { %v205_v36 = vsub.f32 1.5, %v204_v35 }
 0x12a   : > { %v206_v37 = vmul.f32 %v339_v32, %v205_v36 }
 0x12c   : > { %v210_v38 = vsel %vm209_vm6, %v339_v32, %v206_v37 }
 0x12d   : > { %v211_v40 = vmul.f32 %v210_v38, %v194_v26 }
 0x12f   : > { %v213_v42 = vmul.f32 %v212_v39, %v211_v40 }
 0x131   : > { %v215_v43 = vadd.f32 %v214_v41, %v213_v42 }
 0x133   : > { %217 = vst.msk [vmem:[%s160_s10] sm:$0x1] %vm216_vm7, %v215_v43 }
 0x134   : > { %367 = shalt.err (!%p364_p3)
}
 0x135   : > { %293 = dma.vmem_to_hbm [thread:$0]  (%p464_p5), %s230_s11, 16, %s232_s17, %s219_s16  }
 0x136 PF: > { %p299_p4 = scmp.ge.s32.totalorder %s402_s15, 2  ;;  %s243_s29 = sand.u32 1, %s390_s12  }
 0x137   : > { %s244_s30 = scalar_lea.sflag [#allocation3], %s243_s29 }
 0x138   : > { %p296_p7 = pnand %p299_p4, %p468_p6 }
 0x13a   : > { %p297_p8 = pneg %p296_p7 }
 0x13c   : > { %385 = dma.done.wait (%p297_p8), %s244_s30, 16  }
 0x13d   : > { %387 = vsyncadd (%p297_p8), %s244_s30, 4294967280  ;;  %p13_p9 = scmp.ge.s32.totalorder %s451_s18, 4   ;;  %s525_s12 = smov %s394_s13 }
 0x13e   : > { %s526_s13 = smov %s398_s14  ;;  %s527_s14 = smov %s462_s21 }
 0x13f   : > { %s528_s15 = smov %s451_s18  ;;  %15 = sbr.rel (!%p13_p9) target bundleno = 3 (0x3), region = 67 }
 0x144   :  { %249 = vsyncpa [#allocation3], 1 }
 0x145   :  { %251 = vsyncpa [#allocation3 + $0x1], 1 }

// kernel: metaformer_forward.7
= control target key start
LH: loop header
LB: loop body
LE: loop exit
PB: predicated region body
PF: predicated region fallthrough
CT: control target
= control target key end

     0   :  { %16 = vsyncpa [#allocation3], 0  ;;  %s857_s17 = smov 0   ;;  %s1070_s0 = inlined_call_operand.vmem [shape: f32[2,4,64], index: 0, kind: input, shape index: {}]   ;;  %s1071_s1 = inlined_call_operand.vmem [shape: f32[4,4], index: 1, kind: input, shape index: {}]   ;;  %s1072_s2 = inlined_call_operand.vmem [shape: f32[1,64], index: 2, kind: input, shape index: {}]   ;;  %s1073_s3 = inlined_call_operand.vmem [shape: f32[1,64], index: 3, kind: input, shape index: {}]   ;;  %s1074_s4 = inlined_call_operand.vmem [shape: f32[1,64], index: 4, kind: input, shape index: {}]   ;;  %s1075_s5 = inlined_call_operand.vmem [shape: f32[1,64], index: 5, kind: input, shape index: {}]   ;;  %s1076_s6 = inlined_call_operand.vmem [shape: f32[64,256], index: 6, kind: input, shape index: {}]   ;;  %s1077_s7 = inlined_call_operand.vmem [shape: f32[1,256], index: 7, kind: input, shape index: {}]   ;;  %s1078_s8 = inlined_call_operand.vmem [shape: f32[256,64], index: 8, kind: input, shape index: {}]   ;;  %s1079_s9 = inlined_call_operand.vmem [shape: f32[1,64], index: 9, kind: input, shape index: {}]   ;;  %s1080_s10 = inlined_call_operand.vmem [shape: f32[2], index: 10, kind: input, shape index: {}]   ;;  %s1081_s11 = inlined_call_operand.vmem [shape: f32[2,4,64], index: 11, kind: output, shape index: {}]  }
   0x1 LB: > { %s721_s18 = sadd.s32 4294967295, %s793_s17   ;;  %p723_p0 = scmp.ge.s32.totalorder %s793_s17, 1  ;;  %s793_s17 = sphi %s857_s17, %s22_s17  }
   0x2   : > { %p289_p1 = scmp.lt.s32.totalorder %s793_s17, 3  ;;  %s328_s21 = sshll.u32 %s1080_s10, 4  ;;  %s329_s21 = int_to_ptr.vmem [resolvable:$true] %s328_s21 }
   0x3   : > { %p745_p3 = scmp.eq.s32.totalorder %s721_s18, 0  ;;  %s795_s22 = smov [#allocation2]  }
   0x4   : > { %p290_p2 = pnand %p723_p0, %p289_p1 }
   0x6   : > { %p741_p4 = pneg %p290_p2  ;;  %348 = sbr.rel (%p290_p2) target bundleno = 960 (0x3c0), region = 64 }
   0x8   : > { %p742_p5 = pnand %p745_p3, %p741_p4 }
   0xa   : > { %744 = dma.vmem_to_smem (!%p742_p5), %s329_s21, 16, %s795_s22, [#allocation3]  }
   0xb   : > { %788 = dma.done.wait (%p745_p3), [#allocation3], 16  }
   0xc   : > { %790 = vsyncadd (%p745_p3), [#allocation3], 4294967280 }
   0xd   : > { %355 = sfence }
   0xe   : > { %p388_p6 = scmp.lt.s32.totalorder %s721_s18, 1  ;;  %vm399_vm0 = vcmask 519168   ;;  %v796_v2 = vmov 64.0   ;;  %v757_v23 = vld [vmem:[%s1072_s2] ss:$0 sm:$0xff]  ;;  %vm442_vm5 = vcmask 1043456  }
   0xf   : > { %762 = vrcp.f32 %v796_v2  ;;  %v758_v26 = vld [vmem:[%s1073_s3] ss:$0 sm:$0xff]  ;;  %vm438_vm6 = vcmask 31744   ;;  %v513_v38 = vld [vmem:[%s1076_s6 + $0x70] sm:$0xff]  ;;  %v514_v39 = vld [vmem:[%s1076_s6 + $0x78] sm:$0xff]  ;;  %vm521_vm10 = vcmask 523264  }
  0x10   : > { %s1083_s18 = smov (!%p388_p6, %s721_s18), 1  ;;  %v437_v29 = vld [vmem:[%s1071_s1] sm:$0xf]  ;;  %553 = vmatpush.msra.mxu2 %v514_v39  ;;  %v512_v41 = vld [vmem:[%s1076_s6 + $0x68] sm:$0xff]  ;;  %v509_v42 = vld [vmem:[%s1076_s6 + $0x50] sm:$0xff]  ;;  %s567_s22 = sld [smem:[#allocation2]] }
  0x11   : > { %s728_s23 = sshll.u32 %s1083_s18, 2  ;;  %v511_v40 = vld [vmem:[%s1076_s6 + $0x60] sm:$0xff]  ;;  %v510_v43 = vld [vmem:[%s1076_s6 + $0x58] sm:$0xff]  ;;  %v508_v45 = vld [vmem:[%s1076_s6 + $0x48] sm:$0xff]  ;;  %s734_s24 = sld [smem:[#allocation2 + $0x1]] }
  0x12   : > { %s391_s26 = scalar_lea.vmem %s1070_s0, %s728_s23  ;;  %554 = vmatpush.msra.mxu2 %v512_v41  ;;  %v507_v44 = vld [vmem:[%s1076_s6 + $0x40] sm:$0xff]  ;;  %v505_v46 = vld [vmem:[%s1076_s6 + $0x30] sm:$0xff]  ;;  %v506_v47 = vld [vmem:[%s1076_s6 + $0x38] sm:$0xff]  ;;  %s395_s29 = scalar_lea.vmem %s1081_s11, %s728_s23 }
  0x13   : > { %v396_v0 = vld [vmem:[%s391_s26] sm:$0xf]  ;;  %v504_v49 = vld [vmem:[%s1076_s6 + $0x28] sm:$0xff]  ;;  %v501_v50 = vld [vmem:[%s1076_s6 + $0x10] sm:$0xff] }
  0x14   : > { %v400_v1 = vsel %vm399_vm0, %v396_v0, 0.0  ;;  %555 = vmatpush.msra.mxu2 %v510_v43  ;;  %v503_v48 = vld [vmem:[%s1076_s6 + $0x20] sm:$0xff]  ;;  %v502_v51 = vld [vmem:[%s1076_s6 + $0x18] sm:$0xff]  ;;  %v500_v53 = vld [vmem:[%s1076_s6 + $0x8] sm:$0xff] }
  0x15   : > { %401 = vadd.xlane.f32.xlu0 %v400_v1  ;;  %v763_v3 = vpop.eup %762  ;;  %v499_v52 = vld [vmem:[%s1076_s6] sm:$0xff]  ;;  %v592_v54 = vld [vmem:[%s1078_s8 + $0x78] sm:$0xff]  ;;  %v591_v55 = vld [vmem:[%s1078_s8 + $0x70] sm:$0xff] }
  0x16   : > { %v404_v4 = vmul.f32 64.0, %v763_v3  ;;  %vm408_vm1 = vweird.f32 %v763_v3  ;;  %556 = vmatpush.msra.mxu2 %v508_v45  ;;  %609 = vmatpush.msra.mxu3 %v592_v54  ;;  %v608_v56 = vld [vmem:[%s1078_s8 + $0xf8] sm:$0xff]  ;;  %v590_v57 = vld [vmem:[%s1078_s8 + $0x68] sm:$0xff]  ;;  %v607_v58 = vld [vmem:[%s1078_s8 + $0xf0] sm:$0xff] }
  0x17   : > { %629 = vmatpush.msra.mxu0 %v608_v56  ;;  %v606_v60 = vld [vmem:[%s1078_s8 + $0xe8] sm:$0xff]  ;;  %v589_v62 = vld [vmem:[%s1078_s8 + $0x60] sm:$0xff]  ;;  %v588_v1 = vld [vmem:[%s1078_s8 + $0x58] sm:$0xff] }
  0x18   : > { %v405_v5 = vsub.f32 1.0, %v404_v4  ;;  %557 = vmatpush.msra.mxu2 %v506_v47  ;;  %610 = vmatpush.msra.mxu3 %v591_v55  ;;  %v605_v63 = vld [vmem:[%s1078_s8 + $0xe0] sm:$0xff]  ;;  %v604_v2 = vld [vmem:[%s1078_s8 + $0xd8] sm:$0xff]  ;;  %v603_v4 = vld [vmem:[%s1078_s8 + $0xd0] sm:$0xff]  ;;  %v574_v47 = vstv %s734_s24 }
  0x19   : > { %630 = vmatpush.msra.mxu0 %v607_v58  ;;  %v761_v58 = vld [vmem:[%s1079_s9] ss:$0 sm:$0xff] }
  0x1a   : > { %v406_v6 = vmul.f32 %v763_v3, %v405_v5  ;;  %558 = vmatpush.msra.mxu2 %v504_v49  ;;  %611 = vmatpush.msra.mxu3 %v590_v57  ;;  %v586_v5 = vld [vmem:[%s1078_s8 + $0x48] sm:$0xff] }
  0x1b   : > { %631 = vmatpush.msra.mxu0 %v606_v60 }
  0x1c   : > { %v407_v7 = vadd.f32 %v763_v3, %v406_v6  ;;  %559 = vmatpush.msra.mxu2 %v502_v51  ;;  %612 = vmatpush.msra.mxu3 %v589_v62  ;;  %v602_v6 = vld [vmem:[%s1078_s8 + $0xc8] sm:$0xff] }
  0x1d   : > { %632 = vmatpush.msra.mxu0 %v605_v63 }
  0x1e   : > { %v877_v8 = vsel %vm408_vm1, %v763_v3, %v407_v7  ;;  %560 = vmatpush.msra.mxu2 %v500_v53  ;;  %v587_v3 = vld [vmem:[%s1078_s8 + $0x50] sm:$0xff]  ;;  %613 = vmatpush.msra.mxu3 %v588_v1  ;;  %v585_v7 = vld [vmem:[%s1078_s8 + $0x40] sm:$0xff] }
  0x1f   : > { %633 = vmatpush.msra.mxu0 %v604_v2 }
  0x20   : > { %614 = vmatpush.msra.mxu3 %v587_v3 }
  0x21   : > { %634 = vmatpush.msra.mxu0 %v603_v4 }
  0x22   : > { %615 = vmatpush.msra.mxu3 %v586_v5 }
  0x23   : > { %635 = vmatpush.msra.mxu0 %v602_v6 }
  0x24   : > { %616 = vmatpush.msra.mxu3 %v585_v7 }
  0x88   : > { %v402_v9 = vpop.xlane.xlu0 %401 }
  0x89   : > { %v410_v10 = vmul.f32 %v877_v8, %v402_v9  ;;  %v584_v9 = vld [vmem:[%s1078_s8 + $0x38] sm:$0xff] }
  0x8a   : > { %617 = vmatpush.msra.mxu3 %v584_v9 }
  0x8b   : > { %v411_v11 = vsub.f32 %v396_v0, %v410_v10 }
  0x8d   : > { %v412_v12 = vmul.f32 %v411_v11, %v411_v11 }
  0x8f   : > { %v413_v13 = vsel %vm399_vm0, %v412_v12, 0.0 }
  0x90   : > { %414 = vadd.xlane.f32.xlu0 %v413_v13 }
 0x103   : > { %v415_v14 = vpop.xlane.xlu0 %414 }
 0x104   : > { %v416_v15 = vmul.f32 %v415_v14, %v877_v8 }
 0x106   : > { %v417_v16 = vadd.f32 1e-05, %v416_v15 }
 0x108   : > { %764 = vrsqrt.f32 %v417_v16  ;;  %vm424_vm3 = vweird.f32 %v417_v16 }
 0x10e   : > { %v765_v17 = vpop.eup %764 }
 0x10f   : > { %v419_v18 = vmul.f32 %v765_v17, %v417_v16  ;;  %vm425_vm2 = vweird.f32 %v765_v17  ;;  %v759_v16 = vld [vmem:[%s1074_s4] ss:$0 sm:$0xff] }
 0x110   : > { %vm426_vm4 = vmor %vm424_vm3, %vm425_vm2 }
 0x111   : > { %v420_v19 = vmul.f32 %v765_v17, %v419_v18 }
 0x113   : > { %v421_v20 = vmul.f32 0.5, %v420_v19  ;;  %v760_v19 = vld [vmem:[%s1075_s5] ss:$0 sm:$0xff] }
 0x115   : > { %v422_v21 = vsub.f32 1.5, %v421_v20 }
 0x117   : > { %v423_v22 = vmul.f32 %v765_v17, %v422_v21 }
 0x119   : > { %v427_v24 = vsel %vm426_vm4, %v765_v17, %v423_v22  ;;  %v582_v22 = vld [vmem:[%s1078_s8 + $0x28] sm:$0xff] }
 0x11a   : > { %v428_v25 = vmul.f32 %v427_v24, %v411_v11  ;;  %v583_v11 = vld [vmem:[%s1078_s8 + $0x30] sm:$0xff]  ;;  %v581_v24 = vld [vmem:[%s1078_s8 + $0x20] sm:$0xff] }
 0x11b   : > { %618 = vmatpush.msra.mxu3 %v583_v11 }
 0x11c   : > { %v432_v27 = vmul.f32 %v757_v23, %v428_v25  ;;  %v601_v23 = vld [vmem:[%s1078_s8 + $0xc0] sm:$0xff]  ;;  %v600_v25 = vld [vmem:[%s1078_s8 + $0xb8] sm:$0xff] }
 0x11d   : > { %619 = vmatpush.msra.mxu3 %v582_v22  ;;  %636 = vmatpush.msra.mxu0 %v601_v23 }
 0x11e   : > { %v436_v28 = vadd.f32 %v758_v26, %v432_v27  ;;  %v580_v26 = vld [vmem:[%s1078_s8 + $0x18] sm:$0xff]  ;;  %v599_v27 = vld [vmem:[%s1078_s8 + $0xb0] sm:$0xff] }
 0x11f   : > { %620 = vmatpush.msra.mxu3 %v581_v24  ;;  %637 = vmatpush.msra.mxu0 %v600_v25 }
 0x120   : > { %730 = vmatpush.msk.msra.mxu1 %vm442_vm5, %v436_v28  ;;  %v579_v28 = vld [vmem:[%s1078_s8 + $0x10] sm:$0xff] }
 0x121   : > { %731 = vmatmul.msk.f32.vlgmr.msra.gmra.mxu1 %vm438_vm6, %v437_v29  ;;  %621 = vmatpush.msra.mxu3 %v580_v26  ;;  %v598_v29 = vld [vmem:[%s1078_s8 + $0xa8] sm:$0xff] }
 0x122   : > { %533 = vmatpush.msrb.mxu1 %v513_v38  ;;  %638 = vmatpush.msra.mxu0 %v599_v27  ;;  %v515_v38 = vld [vmem:[%s1077_s7] sm:$0x3] }
 0x123   : > { %622 = vmatpush.msra.mxu3 %v579_v28  ;;  %v517_v39 = vperm.slane %v515_v38, 0 }
 0x124   : > { %534 = vmatpush.msrb.mxu1 %v511_v40  ;;  %639 = vmatpush.msra.mxu0 %v598_v29 }
 0x126   : > { %535 = vmatpush.msrb.mxu1 %v509_v42  ;;  %v568_v42 = vstv %s567_s22 }
 0x128   : > { %536 = vmatpush.msrb.mxu1 %v507_v44  ;;  %v518_v44 = vperm.slane %v515_v38, 1 }
 0x12a   : > { %537 = vmatpush.msrb.mxu1 %v505_v46 }
 0x12c   : > { %538 = vmatpush.msrb.mxu1 %v503_v48 }
 0x12e   : > { %539 = vmatpush.msrb.mxu1 %v501_v50 }
 0x130   : > { %540 = vmatpush.msrb.mxu1 %v499_v52 }
 0x19e   : > { %v463_v30 = vpop.f32.mrf.mxu1 }
 0x19f   : > { %v891_v31 = vadd.f32 %v463_v30, %v396_v0  ;;  %v578_v30 = vld [vmem:[%s1078_s8 + $0x8] sm:$0xff] }
 0x1a0   : > { %623 = vmatpush.msra.mxu3 %v578_v30 }
 0x1a1   : > { %v469_v32 = vsel %vm399_vm0, %v891_v31, 0.0 }
 0x1a2   : > { %470 = vadd.xlane.f32.xlu1 %v469_v32  ;;  %v597_v32 = vld [vmem:[%s1078_s8 + $0xa0] sm:$0xff] }
 0x1a3   : > { %640 = vmatpush.msra.mxu0 %v597_v32 }
 0x215   : > { %v471_v33 = vpop.xlane.xlu1 %470 }
 0x216   : > { %v472_v34 = vmul.f32 %v471_v33, %v877_v8  ;;  %v577_v33 = vld [vmem:[%s1078_s8] sm:$0xff] }
 0x217   : > { %624 = vmatpush.msra.mxu3 %v577_v33 }
 0x218   : > { %v897_v35 = vsub.f32 %v891_v31, %v472_v34  ;;  %v596_v34 = vld [vmem:[%s1078_s8 + $0x98] sm:$0xff] }
 0x219   : > { %641 = vmatpush.msra.mxu0 %v596_v34 }
 0x21a   : > { %v474_v36 = vmul.f32 %v897_v35, %v897_v35 }
 0x21c   : > { %v475_v37 = vsel %vm399_vm0, %v474_v36, 0.0  ;;  %v594_v36 = vld [vmem:[%s1078_s8 + $0x88] sm:$0xff] }
 0x21d   : > { %476 = vadd.xlane.f32.xlu1 %v475_v37  ;;  %v593_v37 = vld [vmem:[%s1078_s8 + $0x80] sm:$0xff] }
 0x290   : > { %v477_v59 = vpop.xlane.xlu1 %476 }
 0x291   : > { %v478_v61 = vmul.f32 %v477_v59, %v877_v8 }
 0x293   : > { %v479_v0 = vadd.f32 1e-05, %v478_v61 }
 0x295   : > { %766 = vrsqrt.f32 %v479_v0  ;;  %vm486_vm8 = vweird.f32 %v479_v0 }
 0x29b   : > { %v767_v8 = vpop.eup %766 }
 0x29c   : > { %v481_v10 = vmul.f32 %v767_v8, %v479_v0  ;;  %vm487_vm7 = vweird.f32 %v767_v8 }
 0x29d   : > { %vm488_vm9 = vmor %vm486_vm8, %vm487_vm7 }
 0x29e   : > { %v482_v12 = vmul.f32 %v767_v8, %v481_v10 }
 0x2a0   : > { %v483_v13 = vmul.f32 0.5, %v482_v12 }
 0x2a2   : > { %v484_v14 = vsub.f32 1.5, %v483_v13 }
 0x2a4   : > { %v485_v15 = vmul.f32 %v767_v8, %v484_v14 }
 0x2a6   : > { %v489_v17 = vsel %vm488_vm9, %v767_v8, %v485_v15 }
 0x2a7   : > { %v490_v18 = vmul.f32 %v489_v17, %v897_v35  ;;  %v595_v35 = vld [vmem:[%s1078_s8 + $0x90] sm:$0xff] }
 0x2a8   : > { %642 = vmatpush.msra.mxu0 %v595_v35 }
 0x2a9   : > { %v494_v20 = vmul.f32 %v759_v16, %v490_v18 }
 0x2aa   : > { %643 = vmatpush.msra.mxu0 %v594_v36 }
 0x2ab   : > { %v498_v21 = vadd.f32 %v760_v19, %v494_v20 }
 0x2ac   : > { %644 = vmatpush.msra.mxu0 %v593_v37 }
 0x2ad   : > { %732 = vmatmul.msk.f32.vlgmr.msrb.gmra.mxu1 %vm521_vm10, %v498_v21  ;;  %733 = vmatmul.msk.f32.vlgmr.msra.gmra.mxu2 %vm521_vm10, %v498_v21 }
 0x32a   : > { %v542_v40 = vpop.f32.mrf.mxu1 }
 0x32b   : > { %v543_v41 = vadd.f32 %v542_v40, %v517_v39 }
 0x32d   : > { %v565_v43 = vmax.f32 %v543_v41, 0.0 }
 0x32f   : > { %v569_v45 = vmul.f32 %v568_v42, %v565_v43 }
 0x330   : > { %v562_v46 = vpop.f32.mrf.mxu2 }
 0x331   : > { %v571_v48 = vmul.f32 %v569_v45, %v565_v43  ;;  %v563_v49 = vadd.f32 %v562_v46, %v518_v44 }
 0x333   : > { %v566_v50 = vmax.f32 %v563_v49, 0.0  ;;  %v575_v51 = vadd.f32 %v574_v47, %v571_v48 }
 0x335   : > { %v570_v52 = vmul.f32 %v568_v42, %v566_v50  ;;  %625 = vmatmul.f32.vlgmr.msra.gmra.mxu3 %v575_v51 }
 0x337   : > { %v572_v53 = vmul.f32 %v570_v52, %v566_v50 }
 0x339   : > { %v576_v54 = vadd.f32 %v574_v47, %v572_v53 }
 0x33b   : > { %645 = vmatmul.f32.vlgmr.msra.gmra.mxu0 %v576_v54 }
 0x3b8   : > { %v626_v55 = vpop.f32.mrf.mxu3  ;;  %v646_v56 = vpop.f32.mrf.mxu0 }
 0x3b9   : > { %v647_v57 = vadd.f32 %v646_v56, %v626_v55 }
 0x3bb   : > { %v649_v59 = vadd.f32 %v647_v57, %v891_v31 }
 0x3bd   : > { %v654_v60 = vadd.f32 %v761_v58, %v649_v59 }
 0x3bf   : > { %655 = vst.msk [vmem:[%s395_s29] sm:$0xf] %vm399_vm0, %v654_v60 }
 0x3c0 PF: > { %s22_s17 = sadd.s32 1, %s793_s17  }
 0x3c1   : > { %p19_p7 = scmp.ge.s32.totalorder %s22_s17, 4  }
 0x3c3   :  { %21 = sbr.rel (!%p19_p7) target bundleno = 1 (0x1), region = 99 }
 0x3c8   :  { %675 = vsyncpa [#allocation3], 1 }
 0x3c9   :  { %677 = vsyncpa [#allocation3 + $0x1], 1 }

</bundles_post_ra>
